<compile_context>
chip_gen: v6e
topology: v6e:2x2x1
jax: 0.10.0
libtpu: 0.0.40
codegen_flags: <defaults>
</compile_context>

<pallas_src>
import math

import jax
import jax.numpy as jnp
from jax.experimental import pallas as pl
from jax.experimental.pallas import tpu as pltpu

H1 = 128          # fc1 out_features
H2 = 64           # fc2 out_features
HEAD_PAD = 128    # lane-dense head / output width


def dueling_dqn_kernel(x_ref, w1_ref, b1_ref, w2_ref, b2_ref,
                       wh_ref, bh_ref, o_ref):
    # fc1 + relu
    h1 = jnp.dot(x_ref[...], w1_ref[...],
                 preferred_element_type=jnp.float32) + b1_ref[...]
    h1 = jnp.maximum(h1, 0.0)

    # fc2 + relu
    h2 = jnp.dot(h1, w2_ref[...],
                 preferred_element_type=jnp.float32) + b2_ref[...]
    h2 = jnp.maximum(h2, 0.0)

    # Folded dueling head: value + advantage - mean(advantage) is already baked
    # into wh/bh, so this matmul's result is directly storable (lane-dense 128).
    o_ref[...] = jnp.dot(h2, wh_ref[...],
                         preferred_element_type=jnp.float32) + bh_ref[...]


def fuse_head_params(params):
    """Fold the dueling combine into the head weights (done once, not per call).

    out = (h2@wv + bv) + (h2@wa + ba) - mean(h2@wa + ba, axis=1)
        = h2 @ (wv + wa - mean(wa, axis=1)) + (bv + ba - mean(ba, axis=1))
    Result is zero-padded to HEAD_PAD output lanes for unmasked stores.
    """
    wv, bv = params["wv"], params["bv"]            # (64, 1), (1, 1)
    wa, ba = params["wa"], params["ba"]            # (64, A), (1, A)
    A = wa.shape[1]

    w_out = wa + wv - jnp.mean(wa, axis=1, keepdims=True)   # (64, A)
    b_out = ba + bv - jnp.mean(ba, axis=1, keepdims=True)   # (1, A)

    wh = jnp.zeros((H2, HEAD_PAD), jnp.float32).at[:, :A].set(w_out)
    bh = jnp.zeros((1, HEAD_PAD), jnp.float32).at[:, :A].set(b_out)

    return dict(w1=params["w1"], b1=params["b1"],
                w2=params["w2"], b2=params["b2"],
                wh=wh, bh=bh, num_outputs=A)


def dueling_dqn_forward(x, fused, batch_tile=256):
    """x: (B, num_inputs) float32. fused: output of fuse_head_params()."""
    B, num_inputs = x.shape
    A = fused["num_outputs"]

    # Batch tiling: pad B up to a multiple of the tile so every block is full.
    if B <= batch_tile:
        tb, Bp, xp = B, B, x
    else:
        tb = batch_tile
        Bp = pl.cdiv(B, tb) * tb
        xp = jnp.pad(x, ((0, Bp - B), (0, 0)))

    grid = (Bp // tb,)
    # Only ask for cross-core batch sharding when there is actually >1 tile.
    semantics = ("parallel",) if grid[0] > 1 else ("arbitrary",)

    in_specs = [
        pl.BlockSpec((tb, num_inputs), lambda i: (i, 0)),   # x: tiled over batch
        pl.BlockSpec((num_inputs, H1), lambda i: (0, 0)),   # w1 (VMEM resident)
        pl.BlockSpec((1, H1), lambda i: (0, 0)),            # b1
        pl.BlockSpec((H1, H2), lambda i: (0, 0)),           # w2
        pl.BlockSpec((1, H2), lambda i: (0, 0)),            # b2
        pl.BlockSpec((H2, HEAD_PAD), lambda i: (0, 0)),     # folded head weight
        pl.BlockSpec((1, HEAD_PAD), lambda i: (0, 0)),      # folded head bias
    ]
    out_spec = pl.BlockSpec((tb, HEAD_PAD), lambda i: (i, 0))

    flops = 2 * Bp * (num_inputs * H1 + H1 * H2 + H2 * HEAD_PAD)
    bytes_accessed = 4 * (
        Bp * num_inputs + Bp * HEAD_PAD                       # x + padded out
        + num_inputs * H1 + H1 + H1 * H2 + H2                 # w1,b1,w2,b2
        + H2 * HEAD_PAD + HEAD_PAD                            # folded head
    )

    out = pl.pallas_call(
        dueling_dqn_kernel,
        out_shape=jax.ShapeDtypeStruct((Bp, HEAD_PAD), jnp.float32),
        grid=grid,
        in_specs=in_specs,
        out_specs=out_spec,
        compiler_params=pltpu.CompilerParams(dimension_semantics=semantics),
        cost_estimate=pl.CostEstimate(
            flops=flops, transcendentals=0, bytes_accessed=bytes_accessed),
    )(xp, fused["w1"], fused["b1"], fused["w2"], fused["b2"],
      fused["wh"], fused["bh"])

    return out[:B, :A]


def init_params(key, num_inputs, num_outputs):
    """Deterministic PyTorch-Linear-style init (uniform +-1/sqrt(fan_in))."""
    def linear(k, fan_in, fan_out):
        kw, kb = jax.random.split(k)
        bound = 1.0 / math.sqrt(fan_in)
        w = jax.random.uniform(kw, (fan_in, fan_out), jnp.float32, -bound, bound)
        b = jax.random.uniform(kb, (1, fan_out), jnp.float32, -bound, bound)
        return w, b

    k1, k2, k3, k4 = jax.random.split(key, 4)
    w1, b1 = linear(k1, num_inputs, H1)
    w2, b2 = linear(k2, H1, H2)
    wv, bv = linear(k3, H2, 1)
    wa, ba = linear(k4, H2, num_outputs)
    return dict(w1=w1, b1=b1, w2=w2, b2=b2, wv=wv, bv=bv, wa=wa, ba=ba)


def reference_forward(x, p):
    h1 = jax.nn.relu(x @ p["w1"] + p["b1"])
    h2 = jax.nn.relu(h1 @ p["w2"] + p["b2"])
    v = h2 @ p["wv"] + p["bv"]
    a = h2 @ p["wa"] + p["ba"]
    return v + a - jnp.mean(a, axis=1, keepdims=True)


if __name__ == "__main__":
    num_inputs = 32    # state-space size
    num_outputs = 4    # action-space size
    batch = 8

    key = jax.random.PRNGKey(0)
    kx, kp = jax.random.split(key)
    x = jax.random.normal(kx, (batch, num_inputs), dtype=jnp.float32)
    params = init_params(kp, num_inputs, num_outputs)
    fused = jax.tree_util.tree_map(jax.block_until_ready, fuse_head_params(params))

    out = jax.block_until_ready(dueling_dqn_forward(x, fused))
    ref = reference_forward(x, params)
    assert out.shape == (batch, num_outputs)
    assert jnp.allclose(out, ref, atol=1e-4, rtol=1e-4)

    # Also exercise the multi-tile / padded-batch path (grid > 1, parallel axis).
    big_b = 700
    xb = jax.random.normal(jax.random.PRNGKey(1), (big_b, num_inputs), jnp.float32)
    out_big = jax.block_until_ready(dueling_dqn_forward(xb, fused, batch_tile=256))
    assert out_big.shape == (big_b, num_outputs)
    assert jnp.allclose(out_big, reference_forward(xb, params), atol=1e-4, rtol=1e-4)

    print("KERNEL_OK")
</pallas_src>

<mosaic_0001>
module attributes {stable_mosaic.version = 11 : i64} {
  func.func @dueling_dqn_kernel(%arg0: i32, %arg1: memref<8x32xf32, #tpu.memory_space<vmem>>, %arg2: memref<32x128xf32, #tpu.memory_space<vmem>>, %arg3: memref<1x128xf32, #tpu.memory_space<vmem>>, %arg4: memref<128x64xf32, #tpu.memory_space<vmem>>, %arg5: memref<1x64xf32, #tpu.memory_space<vmem>>, %arg6: memref<64x128xf32, #tpu.memory_space<vmem>>, %arg7: memref<1x128xf32, #tpu.memory_space<vmem>>, %arg8: memref<8x128xf32, #tpu.memory_space<vmem>>) attributes {dimension_semantics = [#tpu.dimension_semantics<arbitrary>], iteration_bounds = array<i64: 1>, scalar_prefetch = 0 : i64, scratch_operands = 0 : i64, tpu.core_type = #tpu.core_type<tc>, window_params = [{transform_indices = @transform_0, window_bounds = array<i64: 8, 32>}, {pipeline_mode = #tpu.pipeline_mode<synchronous>, transform_indices = @transform_1, window_bounds = array<i64: 32, 128>}, {pipeline_mode = #tpu.pipeline_mode<synchronous>, transform_indices = @transform_2, window_bounds = array<i64: 1, 128>}, {pipeline_mode = #tpu.pipeline_mode<synchronous>, transform_indices = @transform_3, window_bounds = array<i64: 128, 64>}, {pipeline_mode = #tpu.pipeline_mode<synchronous>, transform_indices = @transform_4, window_bounds = array<i64: 1, 64>}, {pipeline_mode = #tpu.pipeline_mode<synchronous>, transform_indices = @transform_5, window_bounds = array<i64: 64, 128>}, {pipeline_mode = #tpu.pipeline_mode<synchronous>, transform_indices = @transform_6, window_bounds = array<i64: 1, 128>}, {transform_indices = @transform_7, window_bounds = array<i64: 8, 128>}]} {
    %c0 = arith.constant 0 : index
    %c0_0 = arith.constant 0 : index
    %0 = vector.load %arg1[%c0, %c0_0] : memref<8x32xf32, #tpu.memory_space<vmem>>, vector<8x32xf32>
    %c0_1 = arith.constant 0 : index
    %c0_2 = arith.constant 0 : index
    %1 = vector.load %arg2[%c0_1, %c0_2] : memref<32x128xf32, #tpu.memory_space<vmem>>, vector<32x128xf32>
    %cst = arith.constant dense<0.000000e+00> : vector<8x128xf32>
    %2 = tpu.matmul %0, %1, %cst {dimension_numbers = #tpu.dot_dimension_numbers<[1], [0], [0], [1], [0, 0, 1, 1], [], []>} : vector<8x32xf32>, vector<32x128xf32>, vector<8x128xf32> -> vector<8x128xf32>
    %c0_3 = arith.constant 0 : index
    %c0_4 = arith.constant 0 : index
    %3 = vector.load %arg3[%c0_3, %c0_4] : memref<1x128xf32, #tpu.memory_space<vmem>>, vector<1x128xf32>
    %4 = vector.broadcast %3 : vector<1x128xf32> to vector<8x128xf32>
    %5 = arith.addf %2, %4 : vector<8x128xf32>
    %cst_5 = arith.constant 0.000000e+00 : f32
    %6 = vector.broadcast %cst_5 : f32 to vector<8x128xf32>
    %7 = arith.maximumf %5, %6 : vector<8x128xf32>
    %c0_6 = arith.constant 0 : index
    %c0_7 = arith.constant 0 : index
    %8 = vector.load %arg4[%c0_6, %c0_7] : memref<128x64xf32, #tpu.memory_space<vmem>>, vector<128x64xf32>
    %cst_8 = arith.constant dense<0.000000e+00> : vector<8x64xf32>
    %9 = tpu.matmul %7, %8, %cst_8 {dimension_numbers = #tpu.dot_dimension_numbers<[1], [0], [0], [1], [0, 0, 1, 1], [], []>} : vector<8x128xf32>, vector<128x64xf32>, vector<8x64xf32> -> vector<8x64xf32>
    %c0_9 = arith.constant 0 : index
    %c0_10 = arith.constant 0 : index
    %10 = vector.load %arg5[%c0_9, %c0_10] : memref<1x64xf32, #tpu.memory_space<vmem>>, vector<1x64xf32>
    %11 = vector.broadcast %10 : vector<1x64xf32> to vector<8x64xf32>
    %12 = arith.addf %9, %11 : vector<8x64xf32>
    %cst_11 = arith.constant 0.000000e+00 : f32
    %13 = vector.broadcast %cst_11 : f32 to vector<8x64xf32>
    %14 = arith.maximumf %12, %13 : vector<8x64xf32>
    %c0_12 = arith.constant 0 : index
    %c0_13 = arith.constant 0 : index
    %15 = vector.load %arg6[%c0_12, %c0_13] : memref<64x128xf32, #tpu.memory_space<vmem>>, vector<64x128xf32>
    %cst_14 = arith.constant dense<0.000000e+00> : vector<8x128xf32>
    %16 = tpu.matmul %14, %15, %cst_14 {dimension_numbers = #tpu.dot_dimension_numbers<[1], [0], [0], [1], [0, 0, 1, 1], [], []>} : vector<8x64xf32>, vector<64x128xf32>, vector<8x128xf32> -> vector<8x128xf32>
    %c0_15 = arith.constant 0 : index
    %c0_16 = arith.constant 0 : index
    %17 = vector.load %arg7[%c0_15, %c0_16] : memref<1x128xf32, #tpu.memory_space<vmem>>, vector<1x128xf32>
    %18 = vector.broadcast %17 : vector<1x128xf32> to vector<8x128xf32>
    %19 = arith.addf %16, %18 : vector<8x128xf32>
    %c0_17 = arith.constant 0 : index
    %c0_18 = arith.constant 0 : index
    %20 = vector.load %arg8[%c0_17, %c0_18] : memref<8x128xf32, #tpu.memory_space<vmem>>, vector<8x128xf32>
    tpu.vector_store %arg8[%c0_17, %c0_18], %19 {strides = array<i32>} : memref<8x128xf32, #tpu.memory_space<vmem>>, vector<8x128xf32>,
    return
  }
  func.func @transform_0(%arg0: i32) -> (i32, i32) {
    %c0_i32 = arith.constant 0 : i32
    %c0_i32_0 = arith.constant 0 : i32
    return %arg0, %c0_i32 : i32, i32
  }
  func.func @transform_1(%arg0: i32) -> (i32, i32) {
    %c0_i32 = arith.constant 0 : i32
    %c0_i32_0 = arith.constant 0 : i32
    %c0_i32_1 = arith.constant 0 : i32
    return %c0_i32, %c0_i32_0 : i32, i32
  }
  func.func @transform_2(%arg0: i32) -> (i32, i32) {
    %c0_i32 = arith.constant 0 : i32
    %c0_i32_0 = arith.constant 0 : i32
    %c0_i32_1 = arith.constant 0 : i32
    return %c0_i32, %c0_i32_0 : i32, i32
  }
  func.func @transform_3(%arg0: i32) -> (i32, i32) {
    %c0_i32 = arith.constant 0 : i32
    %c0_i32_0 = arith.constant 0 : i32
    %c0_i32_1 = arith.constant 0 : i32
    return %c0_i32, %c0_i32_0 : i32, i32
  }
  func.func @transform_4(%arg0: i32) -> (i32, i32) {
    %c0_i32 = arith.constant 0 : i32
    %c0_i32_0 = arith.constant 0 : i32
    %c0_i32_1 = arith.constant 0 : i32
    return %c0_i32, %c0_i32_0 : i32, i32
  }
  func.func @transform_5(%arg0: i32) -> (i32, i32) {
    %c0_i32 = arith.constant 0 : i32
    %c0_i32_0 = arith.constant 0 : i32
    %c0_i32_1 = arith.constant 0 : i32
    return %c0_i32, %c0_i32_0 : i32, i32
  }
  func.func @transform_6(%arg0: i32) -> (i32, i32) {
    %c0_i32 = arith.constant 0 : i32
    %c0_i32_0 = arith.constant 0 : i32
    %c0_i32_1 = arith.constant 0 : i32
    return %c0_i32, %c0_i32_0 : i32, i32
  }
  func.func @transform_7(%arg0: i32) -> (i32, i32) {
    %c0_i32 = arith.constant 0 : i32
    %c0_i32_0 = arith.constant 0 : i32
    return %arg0, %c0_i32 : i32, i32
  }
}

</mosaic_0001>

<bundles_post_ra>
// kernel: tpu_custom_call.1
= control target key start
LH: loop header
LB: loop body
LE: loop exit
PB: predicated region body
PF: predicated region fallthrough
CT: control target
= control target key end

     0   :  { %v438_v1 = vmov 0.0   ;;  %vm439_vm0 = vmmov 0   ;;  %vm39_vm1 = vcmask 261120   ;;  %s614_s0 = inlined_call_operand.vmem [shape: f32[8,32], index: 0, kind: input, shape index: {}]   ;;  %s615_s1 = inlined_call_operand.vmem [shape: f32[32,128], index: 1, kind: input, shape index: {}]   ;;  %s616_s2 = inlined_call_operand.vmem [shape: f32[1,128], index: 2, kind: input, shape index: {}]   ;;  %s617_s3 = inlined_call_operand.vmem [shape: f32[128,64], index: 3, kind: input, shape index: {}]   ;;  %s618_s4 = inlined_call_operand.vmem [shape: f32[1,64], index: 4, kind: input, shape index: {}]   ;;  %s619_s5 = inlined_call_operand.vmem [shape: f32[64,128], index: 5, kind: input, shape index: {}]   ;;  %s620_s6 = inlined_call_operand.vmem [shape: f32[1,128], index: 6, kind: input, shape index: {}]   ;;  %s621_s7 = inlined_call_operand.hbm [shape: f32[8,128], index: 7, kind: output, shape index: {}]  }
   0x1   :  { %v31_v0 = vld [vmem:[%s615_s1 + $0x18] sm:$0xff]  ;;  %348 = vmatprep.subr.mxu0 %v438_v1  ;;  %v30_v2 = vld [vmem:[%s615_s1 + $0x10] sm:$0xff]  ;;  %356 = vmatprep.mubr.msk.f32.mxu0 %vm439_vm0, %v438_v1  ;;  %v29_v5 = vld [vmem:[%s615_s1 + $0x8] sm:$0xff] }
   0x2   :  { %v129_v3 = vld [vmem:[%s617_s3 + $0x78] sm:$0xff]  ;;  %349 = vmatpush3.msra.mxu0 %v31_v0  ;;  %359 = vmatprep.subr.mxu1 %v438_v1  ;;  %v128_v4 = vld [vmem:[%s617_s3 + $0x70] sm:$0xff]  ;;  %v127_v6 = vld [vmem:[%s617_s3 + $0x68] sm:$0xff] }
   0x3   :  { %350 = vmatprep.subr.mxu0 %v438_v1  ;;  %360 = vmatpush3.msra.mxu1 %v129_v3  ;;  %v28_v7 = vld [vmem:[%s615_s1] sm:$0xff] }
   0x4   :  { %351 = vmatpush3.msra.mxu0 %v30_v2  ;;  %361 = vmatprep.subr.mxu1 %v438_v1  ;;  %v27_v8 = vld [vmem:[%s614_s0] sm:$0xff] }
   0x5   :  { %352 = vmatprep.subr.mxu0 %v438_v1  ;;  %362 = vmatpush3.msra.mxu1 %v128_v4  ;;  %v126_v9 = vld [vmem:[%s617_s3 + $0x60] sm:$0xff] }
   0x6   :  { %353 = vmatpush3.msra.mxu0 %v29_v5  ;;  %363 = vmatprep.subr.mxu1 %v438_v1 }
   0x7   :  { %12 = vsyncpa [#allocation3], 0  ;;  %354 = vmatprep.subr.mxu0 %v438_v1  ;;  %364 = vmatpush3.msra.mxu1 %v127_v6  ;;  %v125_v10 = vld [vmem:[%s617_s3 + $0x58] sm:$0xff]  ;;  %v124_v11 = vld [vmem:[%s617_s3 + $0x50] sm:$0xff]  ;;  %vm223_vm2 = vcmask 523264   ;;  %s440_s13 = smov [#allocation2]  }
   0x8   :  { %355 = vmatpush3.msra.mxu0 %v28_v7  ;;  %365 = vmatprep.subr.mxu1 %v438_v1  ;;  %v123_v12 = vld [vmem:[%s617_s3 + $0x48] sm:$0xff]  ;;  %v122_v13 = vld [vmem:[%s617_s3 + $0x40] sm:$0xff]  ;;  %v121_v14 = vld [vmem:[%s617_s3 + $0x38] sm:$0xff]  ;;  %s304_s14 = sshll.u32 %s440_s13, 4  ;;  %s305_s14 = int_to_ptr.vmem [resolvable:$true] %s304_s14 }
   0x9   :  { %357 = vmatmul.mubr.msk.f32.vlgmr.msra.gmra.mxu0 %vm39_vm1, %v27_v8  ;;  %366 = vmatpush3.msra.mxu1 %v126_v9  ;;  %v120_v15 = vld [vmem:[%s617_s3 + $0x30] sm:$0xff]  ;;  %v119_v16 = vld [vmem:[%s617_s3 + $0x28] sm:$0xff]  ;;  %v118_v17 = vld [vmem:[%s617_s3 + $0x20] sm:$0xff]  ;;  %p421_p1 = scmp.lt.s32.totalorder %s305_s14, %s305_s14 }
   0xa   :  { %367 = vmatprep.subr.mxu1 %v438_v1  ;;  %391 = vmatprep.mubr.msk.f32.mxu1 %vm439_vm0, %v438_v1  ;;  %v117_v18 = vld [vmem:[%s617_s3 + $0x18] sm:$0xff]  ;;  %v116_v19 = vld [vmem:[%s617_s3 + $0x10] sm:$0xff]  ;;  %v115_v20 = vld [vmem:[%s617_s3 + $0x8] sm:$0xff] }
   0xb   :  { %368 = vmatpush3.msra.mxu1 %v125_v10  ;;  %394 = vmatprep.subr.mxu0 %v438_v1  ;;  %v114_v21 = vld [vmem:[%s617_s3] sm:$0xff]  ;;  %v215_v22 = vld [vmem:[%s619_s5 + $0x38] sm:$0xff]  ;;  %v214_v23 = vld [vmem:[%s619_s5 + $0x30] sm:$0xff] }
   0xc   :  { %369 = vmatprep.subr.mxu1 %v438_v1  ;;  %410 = vmatprep.mubr.msk.f32.mxu0 %vm439_vm0, %v438_v1  ;;  %v213_v24 = vld [vmem:[%s619_s5 + $0x28] sm:$0xff]  ;;  %v212_v25 = vld [vmem:[%s619_s5 + $0x20] sm:$0xff]  ;;  %v211_v26 = vld [vmem:[%s619_s5 + $0x18] sm:$0xff] }
   0xd   :  { %370 = vmatpush3.msra.mxu1 %v124_v11  ;;  %395 = vmatpush3.msra.mxu0 %v215_v22  ;;  %v312_v27 = vld [vmem:[%s616_s2] ss:$0 sm:$0xff]  ;;  %v210_v32 = vld [vmem:[%s619_s5 + $0x10] sm:$0xff]  ;;  %v209_v33 = vld [vmem:[%s619_s5 + $0x8] sm:$0xff] }
   0xe   :  { %371 = vmatprep.subr.mxu1 %v438_v1  ;;  %396 = vmatprep.subr.mxu0 %v438_v1  ;;  %v208_v34 = vld [vmem:[%s619_s5] sm:$0xff]  ;;  %s416_s5 = scalar_lea.vmem %s305_s14, 128 }
   0xf   :  { %372 = vmatpush3.msra.mxu1 %v123_v12  ;;  %397 = vmatpush3.msra.mxu0 %v214_v23  ;;  %v314_v35 = vld [vmem:[%s618_s4] ss:$0 sm:$0xff]  ;;  %p417_p0 = scmp.ne.s32.totalorder %s305_s14, %s416_s5  ;;  %p422_p2 = scmp.lt.s32.totalorder %s416_s5, %s416_s5 }
  0x10   :  { %373 = vmatprep.subr.mxu1 %v438_v1  ;;  %398 = vmatprep.subr.mxu0 %v438_v1  ;;  %v315_v40 = vld [vmem:[%s620_s6] ss:$0 sm:$0xff] }
  0x11   :  { %374 = vmatpush3.msra.mxu1 %v122_v13  ;;  %399 = vmatpush3.msra.mxu0 %v213_v24  ;;  %p423_p3 = por %p422_p2, %p421_p1 }
  0x12   :  { %375 = vmatprep.subr.mxu1 %v438_v1  ;;  %400 = vmatprep.subr.mxu0 %v438_v1 }
  0x13   :  { %376 = vmatpush3.msra.mxu1 %v121_v14  ;;  %401 = vmatpush3.msra.mxu0 %v212_v25  ;;  %p424_p4 = pnand %p423_p3, %p417_p0 }
  0x14   :  { %377 = vmatprep.subr.mxu1 %v438_v1  ;;  %402 = vmatprep.subr.mxu0 %v438_v1 }
  0x15   :  { %378 = vmatpush3.msra.mxu1 %v120_v15  ;;  %403 = vmatpush3.msra.mxu0 %v211_v26 }
  0x16   :  { %379 = vmatprep.subr.mxu1 %v438_v1  ;;  %404 = vmatprep.subr.mxu0 %v438_v1 }
  0x17   :  { %380 = vmatpush3.msra.mxu1 %v119_v16  ;;  %405 = vmatpush3.msra.mxu0 %v210_v32 }
  0x18   :  { %381 = vmatprep.subr.mxu1 %v438_v1  ;;  %406 = vmatprep.subr.mxu0 %v438_v1 }
  0x19   :  { %382 = vmatpush3.msra.mxu1 %v118_v17  ;;  %407 = vmatpush3.msra.mxu0 %v209_v33 }
  0x1a   :  { %383 = vmatprep.subr.mxu1 %v438_v1  ;;  %408 = vmatprep.subr.mxu0 %v438_v1 }
  0x1b   :  { %384 = vmatpush3.msra.mxu1 %v117_v18  ;;  %409 = vmatpush3.msra.mxu0 %v208_v34 }
  0x1c   :  { %385 = vmatprep.subr.mxu1 %v438_v1 }
  0x1d   :  { %386 = vmatpush3.msra.mxu1 %v116_v19 }
  0x1e   :  { %387 = vmatprep.subr.mxu1 %v438_v1 }
  0x1f   :  { %388 = vmatpush3.msra.mxu1 %v115_v20 }
  0x20   :  { %389 = vmatprep.subr.mxu1 %v438_v1 }
  0x21   :  { %390 = vmatpush3.msra.mxu1 %v114_v21 }
  0xc9   :  { %v109_v28 = vpop.f32.mrf.mxu0 }
  0xca   :  { %v110_v29 = vadd.f32 %v312_v27, %v109_v28 }
  0xcb   :  { %v358_v30 = vpop.f32.mrf.mxu0 }
  0xcc   :  { %v113_v31 = vmax.f32 %v110_v29, 0.0 }
  0xce   :  { %392 = vmatmul.mubr.f32.vlgmr.msra.gmra.mxu1 %v113_v31 }
 0x18e   :  { %v203_v36 = vpop.f32.mrf.mxu1 }
 0x18f   :  { %v204_v37 = vadd.f32 %v314_v35, %v203_v36 }
 0x190   :  { %v393_v38 = vpop.f32.mrf.mxu1 }
 0x191   :  { %v207_v39 = vmax.f32 %v204_v37, 0.0 }
 0x193   :  { %411 = vmatmul.mubr.msk.f32.vlgmr.msra.gmra.mxu0 %vm223_vm2, %v207_v39 }
 0x253   :  { %v293_v41 = vpop.f32.mrf.mxu0 }
 0x254   :  { %v294_v42 = vadd.f32 %v315_v40, %v293_v41 }
 0x255   :  { %v412_v43 = vpop.f32.mrf.mxu0 }
 0x256   :  { %297 = vst [vmem:[#allocation2] sm:$0xff] %v294_v42 }
 0x257   :  { %427 = shalt.err (!%p424_p4)
}
 0x258   :  { %307 = dma.vmem_to_hbm [thread:$0]  %s305_s14, 128, %s621_s7, [#allocation3]  }
 0x259   :  { %436 = dma.done.wait [#allocation3], 128  }
 0x25a   :  { %437 = vsyncadd [#allocation3], 4294967168 }
 0x25b   :  { %311 = vsyncpa [#allocation3], 1 }

</bundles_post_ra>
